<compile_context>
chip_gen: v5e
topology: v5e:2x2
jax: 0.10.0
libtpu: 0.0.40
codegen_flags: <defaults>
</compile_context>

<pallas_src>
import numpy as np
import jax
import jax.numpy as jnp
from jax.experimental import pallas as pl
from jax.experimental.pallas import tpu as pltpu

BN_EPS = 1e-5


def _round_up(n, m):
    return ((n + m - 1) // m) * m


# ----------------------------------------------------------------------------
# One-time parameter preparation (do NOT call per forward — cache the result).
# ----------------------------------------------------------------------------
def prepare_params(params, shift_dim):
    """Pad w1/w4/b4 to lane-dense (multiple-of-128) shapes and stack the six
    BatchNorm affine vectors into one [6, inner] array.  Returns a dict the
    kernel wrapper consumes directly (weights already in their HBM layout)."""
    input_dim = int(np.prod(shift_dim))
    out_dim = int(np.prod(shift_dim))
    din_p = _round_up(input_dim, 128)
    dout_p = _round_up(out_dim, 128)
    inner = int(params["w2"].shape[0])

    w1 = params["w1"]
    if w1.shape[0] != din_p:
        w1 = jnp.pad(w1, ((0, din_p - w1.shape[0]), (0, 0)))
    w4, b4 = params["w4"], params["b4"]
    if w4.shape[1] != dout_p:
        w4 = jnp.pad(w4, ((0, 0), (0, dout_p - w4.shape[1])))
        b4 = jnp.pad(b4, ((0, 0), (0, dout_p - b4.shape[1])))

    bn = jnp.concatenate(
        [params["g1"], params["be1"],
         params["g2"], params["be2"],
         params["g3"], params["be3"]], axis=0)          # [6, inner] f32

    return dict(
        w1=w1, w2=params["w2"], w3=params["w3"], w4=w4, b4=b4, bn=bn,
        input_dim=input_dim, out_dim=out_dim,
        din_p=din_p, dout_p=dout_p, inner=inner,
    )


# ----------------------------------------------------------------------------
# Forward pass
# ----------------------------------------------------------------------------
def latent_deformator_fc(x, prepared, shift_dim):
    """Forward pass of LatentDeformator(type=FC).

    x: [..., *] float32, flattened to [-1, input_dim] like the PyTorch module.
    prepared: output of prepare_params (padded / stacked weights).
    """
    input_dim = prepared["input_dim"]
    out_dim = prepared["out_dim"]
    din_p, dout_p, inner = prepared["din_p"], prepared["dout_p"], prepared["inner"]

    x2d = x.reshape(-1, input_dim).astype(jnp.float32)
    B = x2d.shape[0]
    b_pad = max(_round_up(B, 8), 8)

    pad_rows = b_pad - B
    pad_lanes = din_p - input_dim
    if pad_rows or pad_lanes:
        x2d_p = jnp.pad(x2d, ((0, pad_rows), (0, pad_lanes)))
    else:
        x2d_p = x2d

    needs_mask = pad_rows > 0          # BN statistics must ignore padded rows
    inv_n = 1.0 / float(B)

    def kernel(x_ref, w1_ref, bn_ref, b4_ref,      # auto-DMA'd VMEM inputs
               w2_hbm, w3_hbm, w4_hbm,             # ANY (HBM) inputs
               o_ref,                               # output
               w2_buf, w3_buf, w4_buf, sems):       # scratch
        # Issue the big-weight DMAs up front; they stream while layers 1..3
        # compute, instead of serializing before the body (grid=()).
        cp2 = pltpu.make_async_copy(w2_hbm, w2_buf, sems.at[0]); cp2.start()
        cp3 = pltpu.make_async_copy(w3_hbm, w3_buf, sems.at[1]); cp3.start()
        cp4 = pltpu.make_async_copy(w4_hbm, w4_buf, sems.at[2]); cp4.start()

        x_f32 = x_ref[...]                          # [b_pad, din_p]
        x_bf = x_f32.astype(jnp.bfloat16)

        if needs_mask:
            rows = jax.lax.broadcasted_iota(jnp.int32, (b_pad, 1), 0)
            mask = (rows < B).astype(jnp.float32)
        else:
            mask = None

        def bn(h, row):
            # Train-mode BatchNorm1d (biased variance, eps=1e-5), centered
            # variance (no E[h^2]-mean^2 cancellation), fused affine apply.
            gamma = bn_ref[row:row + 1, :]
            beta = bn_ref[row + 1:row + 2, :]
            hm = h if mask is None else h * mask
            mean = jnp.sum(hm, axis=0, keepdims=True) * inv_n
            c = h - mean
            cm = c if mask is None else c * mask
            var = jnp.sum(cm * cm, axis=0, keepdims=True) * inv_n
            scale = gamma * jax.lax.rsqrt(var + BN_EPS)
            return c * scale + beta

        def elu(h):
            # ELU(alpha=1).  No clamp: the inf in the untaken positive branch
            # is discarded by the where (forward-only optimization).
            return jnp.where(h > 0, h, jnp.exp(h) - 1.0)

        # fc1 (b1 cancels in train-mode BN) -> bn1 -> ELU
        x1 = jnp.dot(x_bf, w1_ref[...], preferred_element_type=jnp.float32)
        h = elu(bn(x1, 0))

        # fc2 -> (+x1) -> bn2 -> ELU
        cp2.wait()
        x2 = jnp.dot(h.astype(jnp.bfloat16), w2_buf[...],
                     preferred_element_type=jnp.float32)
        s12 = x2 + x1
        h = elu(bn(s12, 2))

        # fc3 -> (+x2+x1) -> bn3 -> ELU   (reuse s12)
        cp3.wait()
        x3 = jnp.dot(h.astype(jnp.bfloat16), w3_buf[...],
                     preferred_element_type=jnp.float32)
        h = elu(bn(x3 + s12, 4))

        # fc4 -> + b4 -> residual with the (padded) flattened input
        cp4.wait()
        out = (jnp.dot(h.astype(jnp.bfloat16), w4_buf[...],
                       preferred_element_type=jnp.float32)
               + b4_ref[...] + x_f32)
        o_ref[...] = out.astype(o_ref.dtype)

    in_arrays = (x2d_p, prepared["w1"], prepared["bn"], prepared["b4"],
                 prepared["w2"], prepared["w3"], prepared["w4"])

    def full_spec(a):
        nd = a.ndim
        return pl.BlockSpec(a.shape, lambda *_: (0,) * nd)

    in_specs = [
        full_spec(x2d_p),
        full_spec(prepared["w1"]),
        full_spec(prepared["bn"]),
        full_spec(prepared["b4"]),
        pl.BlockSpec(memory_space=pl.ANY),   # w2 -> manual DMA
        pl.BlockSpec(memory_space=pl.ANY),   # w3 -> manual DMA
        pl.BlockSpec(memory_space=pl.ANY),   # w4 -> manual DMA
    ]

    weight_bytes = sum(
        int(np.prod(prepared[k].shape)) * 2 for k in ("w1", "w2", "w3", "w4"))
    cost = pl.CostEstimate(
        flops=2 * b_pad * (din_p * inner + 2 * inner * inner + inner * dout_p),
        transcendentals=3 * b_pad * inner + 3 * inner,
        bytes_accessed=(int(x2d_p.size) * 4 + b_pad * dout_p * 4
                        + weight_bytes
                        + int(prepared["bn"].size) * 4
                        + int(prepared["b4"].size) * 4),
    )

    out_padded = pl.pallas_call(
        kernel,
        out_shape=jax.ShapeDtypeStruct((b_pad, dout_p), jnp.float32),
        grid=(),  # single step: train-mode BN couples the full batch
        in_specs=in_specs,
        out_specs=pl.BlockSpec((b_pad, dout_p), lambda *_: (0, 0)),
        scratch_shapes=[
            pltpu.VMEM(prepared["w2"].shape, jnp.bfloat16),
            pltpu.VMEM(prepared["w3"].shape, jnp.bfloat16),
            pltpu.VMEM(prepared["w4"].shape, jnp.bfloat16),
            pltpu.SemaphoreType.DMA((3,)),
        ],
        compiler_params=pltpu.CompilerParams(
            # 48 MiB: lifts v5e's 16 MiB default while fitting v7x's 64 MiB
            # physical VMEM with headroom for double-buffered I/O.
            vmem_limit_bytes=48 * 1024 * 1024,
        ),
        cost_estimate=cost,
    )(*in_arrays)

    # Drop the row / lane padding, then the PyTorch tail: pad/truncate to
    # flat_shift_dim (no-op here since out_dim == prod(shift_dim)), then view
    # back to [-1, *shift_dim].
    out2d = out_padded[:B, :out_dim]
    flat_shift_dim = int(np.prod(shift_dim))
    if out2d.shape[1] < flat_shift_dim:
        out2d = jnp.concatenate(
            [out2d, jnp.zeros((B, flat_shift_dim - out2d.shape[1]), out2d.dtype)],
            axis=1)
    elif out2d.shape[1] > flat_shift_dim:
        out2d = out2d[:, :flat_shift_dim]
    return out2d.reshape([-1] + list(shift_dim))


# ----------------------------------------------------------------------------
# Parameters & pure-JAX reference
# ----------------------------------------------------------------------------
def init_params(key, input_dim, inner_dim, out_dim):
    """Deterministic synthetic parameters (PyTorch Linear init convention),
    stored pre-transposed as (in, out) with bf16 weights (the kernel's
    streaming dtype).  BN affine uses PyTorch defaults (gamma=1, beta=0)."""
    ks = jax.random.split(key, 8)

    def lin(kw, kb, fan_in, fan_out):
        bound = 1.0 / np.sqrt(fan_in)
        w = jax.random.uniform(kw, (fan_in, fan_out), jnp.float32, -bound, bound)
        b = jax.random.uniform(kb, (1, fan_out), jnp.float32, -bound, bound)
        return w.astype(jnp.bfloat16), b

    w1, b1 = lin(ks[0], ks[1], input_dim, inner_dim)
    w2, b2 = lin(ks[2], ks[3], inner_dim, inner_dim)
    w3, b3 = lin(ks[4], ks[5], inner_dim, inner_dim)
    w4, b4 = lin(ks[6], ks[7], inner_dim, out_dim)

    ones = lambda n: jnp.ones((1, n), jnp.float32)
    zeros = lambda n: jnp.zeros((1, n), jnp.float32)

    return dict(
        w1=w1, b1=b1, g1=ones(inner_dim), be1=zeros(inner_dim),
        w2=w2, b2=b2, g2=ones(inner_dim), be2=zeros(inner_dim),
        w3=w3, b3=b3, g3=ones(inner_dim), be3=zeros(inner_dim),
        w4=w4, b4=b4,
    )


def reference_forward(x, params, shift_dim):
    """Pure-JAX reference of the module's FC forward (correctness check).
    Mirrors the PyTorch graph (including b1/b2/b3 and the unfused BN) but uses
    the same bf16-weight / bf16-LHS / f32-accumulation matmul recipe as the
    kernel so the tolerance stays tight."""
    input_dim = int(np.prod(shift_dim))
    x2d = x.reshape(-1, input_dim).astype(jnp.float32)

    def dot_bf16(a, w):
        return jnp.dot(a.astype(jnp.bfloat16), w,
                       preferred_element_type=jnp.float32)

    def bn(h, g, b):
        m = jnp.mean(h, axis=0, keepdims=True)
        v = jnp.mean((h - m) ** 2, axis=0, keepdims=True)
        return (h - m) / jnp.sqrt(v + BN_EPS) * g + b

    elu = lambda h: jnp.where(h > 0, h, jnp.exp(jnp.minimum(h, 0.0)) - 1.0)

    x1 = dot_bf16(x2d, params["w1"]) + params["b1"]
    h = elu(bn(x1, params["g1"], params["be1"]))
    x2 = dot_bf16(h, params["w2"]) + params["b2"]
    h = elu(bn(x2 + x1, params["g2"], params["be2"]))
    x3 = dot_bf16(h, params["w3"]) + params["b3"]
    h = elu(bn(x3 + x2 + x1, params["g3"], params["be3"]))
    out = dot_bf16(h, params["w4"]) + params["b4"] + x2d
    return out.reshape([-1] + list(shift_dim))


if __name__ == "__main__":
    # Small, module-consistent shapes: shift_dim=[4,4,4] -> input_dim=out_dim=64
    # (exercises the 64->128 lane-padding path); inner_dim kept small.
    shift_dim = [4, 4, 4]
    input_dim = int(np.prod(shift_dim))   # 64
    out_dim = input_dim                   # 64
    inner_dim = 128                       # (module default is 1024; kept small)
    batch = 8

    key = jax.random.PRNGKey(0)
    k_x, k_p, k_x2 = jax.random.split(key, 3)

    x = jax.random.normal(k_x, (batch, *shift_dim), jnp.float32)
    params = init_params(k_p, input_dim, inner_dim, out_dim)
    prepared = prepare_params(params, shift_dim)   # one-time pad/stack (cached)

    out = jax.block_until_ready(latent_deformator_fc(x, prepared, shift_dim))
    ref = reference_forward(x, params, shift_dim)
    np.testing.assert_allclose(np.asarray(out), np.asarray(ref),
                               rtol=2e-3, atol=2e-3)
    assert out.shape == (batch, *shift_dim)

    # Exercise the row-masked BN path (batch not a multiple of 8).
    x_odd = jax.random.normal(k_x2, (5, *shift_dim), jnp.float32)
    out_odd = jax.block_until_ready(latent_deformator_fc(x_odd, prepared, shift_dim))
    ref_odd = reference_forward(x_odd, params, shift_dim)
    np.testing.assert_allclose(np.asarray(out_odd), np.asarray(ref_odd),
                               rtol=2e-3, atol=2e-3)
    assert out_odd.shape == (5, *shift_dim)

    # TODO(synk): only the default FC branch is implemented; ORTHO's torch_expm
    # (Pade-13 matrix exponential with torch.solve) has no clean Pallas
    # equivalent and the other branches (LINEAR/PROJECTIVE/ID/RANDOM) are
    # trivial matmuls not exercised here.
    print("KERNEL_OK")
</pallas_src>

<mosaic_0001>
module attributes {stable_mosaic.version = 11 : i64} {
  func.func @kernel(%arg0: memref<8x128xf32, #tpu.memory_space<vmem>>, %arg1: memref<128x128xbf16, #tpu.memory_space<vmem>>, %arg2: memref<6x128xf32, #tpu.memory_space<vmem>>, %arg3: memref<1x128xf32, #tpu.memory_space<vmem>>, %arg4: memref<128x128xbf16, #tpu.memory_space<any>>, %arg5: memref<128x128xbf16, #tpu.memory_space<any>>, %arg6: memref<128x128xbf16, #tpu.memory_space<any>>, %arg7: memref<8x128xf32, #tpu.memory_space<vmem>>, %arg8: memref<128x128xbf16, #tpu.memory_space<vmem>>, %arg9: memref<128x128xbf16, #tpu.memory_space<vmem>>, %arg10: memref<128x128xbf16, #tpu.memory_space<vmem>>, %arg11: memref<3x!tpu.dma_semaphore, #tpu.memory_space<semaphore_mem>>) attributes {dimension_semantics = [], scalar_prefetch = 0 : i64, scratch_operands = 4 : i64, tpu.core_type = #tpu.core_type<tc>} {
    %c0_i32 = arith.constant 0 : i32
    %0 = tpu.memref_slice %arg11[%c0_i32] : memref<3x!tpu.dma_semaphore, #tpu.memory_space<semaphore_mem>> -> memref<1x!tpu.dma_semaphore, #tpu.memory_space<semaphore_mem>>
    %1 = tpu.memref_squeeze %0 : memref<1x!tpu.dma_semaphore, #tpu.memory_space<semaphore_mem>> -> memref<!tpu.dma_semaphore, #tpu.memory_space<semaphore_mem>>
    tpu.enqueue_dma source(%arg4 : memref<128x128xbf16, #tpu.memory_space<any>>) target(%arg8 : memref<128x128xbf16, #tpu.memory_space<vmem>>) target_semaphore(%1 : memref<!tpu.dma_semaphore, #tpu.memory_space<semaphore_mem>>)
    %c1_i32 = arith.constant 1 : i32
    %2 = tpu.memref_slice %arg11[%c1_i32] : memref<3x!tpu.dma_semaphore, #tpu.memory_space<semaphore_mem>> -> memref<1x!tpu.dma_semaphore, #tpu.memory_space<semaphore_mem>>
    %3 = tpu.memref_squeeze %2 : memref<1x!tpu.dma_semaphore, #tpu.memory_space<semaphore_mem>> -> memref<!tpu.dma_semaphore, #tpu.memory_space<semaphore_mem>>
    tpu.enqueue_dma source(%arg5 : memref<128x128xbf16, #tpu.memory_space<any>>) target(%arg9 : memref<128x128xbf16, #tpu.memory_space<vmem>>) target_semaphore(%3 : memref<!tpu.dma_semaphore, #tpu.memory_space<semaphore_mem>>)
    %c2_i32 = arith.constant 2 : i32
    %4 = tpu.memref_slice %arg11[%c2_i32] : memref<3x!tpu.dma_semaphore, #tpu.memory_space<semaphore_mem>> -> memref<1x!tpu.dma_semaphore, #tpu.memory_space<semaphore_mem>>
    %5 = tpu.memref_squeeze %4 : memref<1x!tpu.dma_semaphore, #tpu.memory_space<semaphore_mem>> -> memref<!tpu.dma_semaphore, #tpu.memory_space<semaphore_mem>>
    tpu.enqueue_dma source(%arg6 : memref<128x128xbf16, #tpu.memory_space<any>>) target(%arg10 : memref<128x128xbf16, #tpu.memory_space<vmem>>) target_semaphore(%5 : memref<!tpu.dma_semaphore, #tpu.memory_space<semaphore_mem>>)
    %c0 = arith.constant 0 : index
    %c0_0 = arith.constant 0 : index
    %6 = vector.load %arg0[%c0, %c0_0] : memref<8x128xf32, #tpu.memory_space<vmem>>, vector<8x128xf32>
    %7 = arith.truncf %6 : vector<8x128xf32> to vector<8x128xbf16>
    %c0_1 = arith.constant 0 : index
    %c0_2 = arith.constant 0 : index
    %8 = vector.load %arg1[%c0_1, %c0_2] : memref<128x128xbf16, #tpu.memory_space<vmem>>, vector<128x128xbf16>
    %cst = arith.constant dense<0.000000e+00> : vector<8x128xf32>
    %9 = tpu.matmul %7, %8, %cst {dimension_numbers = #tpu.dot_dimension_numbers<[1], [0], [0], [1], [0, 0, 1, 1], [], []>} : vector<8x128xbf16>, vector<128x128xbf16>, vector<8x128xf32> -> vector<8x128xf32>
    %c0_3 = arith.constant 0 : index
    %c0_4 = arith.constant 0 : index
    %10 = vector.load %arg2[%c0_3, %c0_4] : memref<6x128xf32, #tpu.memory_space<vmem>>, vector<1x128xf32>
    %c1 = arith.constant 1 : index
    %c0_5 = arith.constant 0 : index
    %11 = vector.load %arg2[%c1, %c0_5] : memref<6x128xf32, #tpu.memory_space<vmem>>, vector<1x128xf32>
    %cst_6 = arith.constant dense<0.000000e+00> : vector<128xf32>
    %12 = vector.multi_reduction <add>, %9, %cst_6 [0] : vector<8x128xf32> to vector<128xf32>
    %13 = vector.shape_cast %12 : vector<128xf32> to vector<1x128xf32>
    %cst_7 = arith.constant 1.250000e-01 : f32
    %14 = vector.broadcast %cst_7 : f32 to vector<1x128xf32>
    %15 = arith.mulf %13, %14 : vector<1x128xf32>
    %16 = vector.broadcast %15 : vector<1x128xf32> to vector<8x128xf32>
    %17 = arith.subf %9, %16 : vector<8x128xf32>
    %18 = arith.mulf %17, %17 : vector<8x128xf32>
    %cst_8 = arith.constant dense<0.000000e+00> : vector<128xf32>
    %19 = vector.multi_reduction <add>, %18, %cst_8 [0] : vector<8x128xf32> to vector<128xf32>
    %20 = vector.shape_cast %19 : vector<128xf32> to vector<1x128xf32>
    %cst_9 = arith.constant 1.250000e-01 : f32
    %21 = vector.broadcast %cst_9 : f32 to vector<1x128xf32>
    %22 = arith.mulf %20, %21 : vector<1x128xf32>
    %cst_10 = arith.constant 9.99999974E-6 : f32
    %23 = vector.broadcast %cst_10 : f32 to vector<1x128xf32>
    %24 = arith.addf %22, %23 : vector<1x128xf32>
    %25 = math.rsqrt %24 : vector<1x128xf32>
    %26 = arith.mulf %10, %25 : vector<1x128xf32>
    %27 = vector.broadcast %26 : vector<1x128xf32> to vector<8x128xf32>
    %28 = arith.mulf %17, %27 : vector<8x128xf32>
    %29 = vector.broadcast %11 : vector<1x128xf32> to vector<8x128xf32>
    %30 = arith.addf %28, %29 : vector<8x128xf32>
    %cst_11 = arith.constant 0.000000e+00 : f32
    %31 = vector.broadcast %cst_11 : f32 to vector<8x128xf32>
    %32 = arith.cmpf ogt, %30, %31 : vector<8x128xf32>
    %33 = math.exp %30 : vector<8x128xf32>
    %cst_12 = arith.constant 1.000000e+00 : f32
    %34 = vector.broadcast %cst_12 : f32 to vector<8x128xf32>
    %35 = arith.subf %33, %34 : vector<8x128xf32>
    %36 = arith.select %32, %30, %35 : vector<8x128xi1>, vector<8x128xf32>
    %c0_i32_13 = arith.constant 0 : i32
    %37 = tpu.memref_slice %arg11[%c0_i32_13] : memref<3x!tpu.dma_semaphore, #tpu.memory_space<semaphore_mem>> -> memref<1x!tpu.dma_semaphore, #tpu.memory_space<semaphore_mem>>
    %38 = tpu.memref_squeeze %37 : memref<1x!tpu.dma_semaphore, #tpu.memory_space<semaphore_mem>> -> memref<!tpu.dma_semaphore, #tpu.memory_space<semaphore_mem>>
    tpu.wait_dma2 semaphore(%38 : memref<!tpu.dma_semaphore, #tpu.memory_space<semaphore_mem>>) src(%arg4 : memref<128x128xbf16, #tpu.memory_space<any>>) dst(%arg8 : memref<128x128xbf16, #tpu.memory_space<vmem>>)
    %39 = arith.truncf %36 : vector<8x128xf32> to vector<8x128xbf16>
    %c0_14 = arith.constant 0 : index
    %c0_15 = arith.constant 0 : index
    %40 = vector.load %arg8[%c0_14, %c0_15] : memref<128x128xbf16, #tpu.memory_space<vmem>>, vector<128x128xbf16>
    %cst_16 = arith.constant dense<0.000000e+00> : vector<8x128xf32>
    %41 = tpu.matmul %39, %40, %cst_16 {dimension_numbers = #tpu.dot_dimension_numbers<[1], [0], [0], [1], [0, 0, 1, 1], [], []>} : vector<8x128xbf16>, vector<128x128xbf16>, vector<8x128xf32> -> vector<8x128xf32>
    %42 = arith.addf %41, %9 : vector<8x128xf32>
    %c2 = arith.constant 2 : index
    %c0_17 = arith.constant 0 : index
    %43 = vector.load %arg2[%c2, %c0_17] : memref<6x128xf32, #tpu.memory_space<vmem>>, vector<1x128xf32>
    %c3 = arith.constant 3 : index
    %c0_18 = arith.constant 0 : index
    %44 = vector.load %arg2[%c3, %c0_18] : memref<6x128xf32, #tpu.memory_space<vmem>>, vector<1x128xf32>
    %cst_19 = arith.constant dense<0.000000e+00> : vector<128xf32>
    %45 = vector.multi_reduction <add>, %42, %cst_19 [0] : vector<8x128xf32> to vector<128xf32>
    %46 = vector.shape_cast %45 : vector<128xf32> to vector<1x128xf32>
    %cst_20 = arith.constant 1.250000e-01 : f32
    %47 = vector.broadcast %cst_20 : f32 to vector<1x128xf32>
    %48 = arith.mulf %46, %47 : vector<1x128xf32>
    %49 = vector.broadcast %48 : vector<1x128xf32> to vector<8x128xf32>
    %50 = arith.subf %42, %49 : vector<8x128xf32>
    %51 = arith.mulf %50, %50 : vector<8x128xf32>
    %cst_21 = arith.constant dense<0.000000e+00> : vector<128xf32>
    %52 = vector.multi_reduction <add>, %51, %cst_21 [0] : vector<8x128xf32> to vector<128xf32>
    %53 = vector.shape_cast %52 : vector<128xf32> to vector<1x128xf32>
    %cst_22 = arith.constant 1.250000e-01 : f32
    %54 = vector.broadcast %cst_22 : f32 to vector<1x128xf32>
    %55 = arith.mulf %53, %54 : vector<1x128xf32>
    %cst_23 = arith.constant 9.99999974E-6 : f32
    %56 = vector.broadcast %cst_23 : f32 to vector<1x128xf32>
    %57 = arith.addf %55, %56 : vector<1x128xf32>
    %58 = math.rsqrt %57 : vector<1x128xf32>
    %59 = arith.mulf %43, %58 : vector<1x128xf32>
    %60 = vector.broadcast %59 : vector<1x128xf32> to vector<8x128xf32>
    %61 = arith.mulf %50, %60 : vector<8x128xf32>
    %62 = vector.broadcast %44 : vector<1x128xf32> to vector<8x128xf32>
    %63 = arith.addf %61, %62 : vector<8x128xf32>
    %cst_24 = arith.constant 0.000000e+00 : f32
    %64 = vector.broadcast %cst_24 : f32 to vector<8x128xf32>
    %65 = arith.cmpf ogt, %63, %64 : vector<8x128xf32>
    %66 = math.exp %63 : vector<8x128xf32>
    %cst_25 = arith.constant 1.000000e+00 : f32
    %67 = vector.broadcast %cst_25 : f32 to vector<8x128xf32>
    %68 = arith.subf %66, %67 : vector<8x128xf32>
    %69 = arith.select %65, %63, %68 : vector<8x128xi1>, vector<8x128xf32>
    %c1_i32_26 = arith.constant 1 : i32
    %70 = tpu.memref_slice %arg11[%c1_i32_26] : memref<3x!tpu.dma_semaphore, #tpu.memory_space<semaphore_mem>> -> memref<1x!tpu.dma_semaphore, #tpu.memory_space<semaphore_mem>>
    %71 = tpu.memref_squeeze %70 : memref<1x!tpu.dma_semaphore, #tpu.memory_space<semaphore_mem>> -> memref<!tpu.dma_semaphore, #tpu.memory_space<semaphore_mem>>
    tpu.wait_dma2 semaphore(%71 : memref<!tpu.dma_semaphore, #tpu.memory_space<semaphore_mem>>) src(%arg5 : memref<128x128xbf16, #tpu.memory_space<any>>) dst(%arg9 : memref<128x128xbf16, #tpu.memory_space<vmem>>)
    %72 = arith.truncf %69 : vector<8x128xf32> to vector<8x128xbf16>
    %c0_27 = arith.constant 0 : index
    %c0_28 = arith.constant 0 : index
    %73 = vector.load %arg9[%c0_27, %c0_28] : memref<128x128xbf16, #tpu.memory_space<vmem>>, vector<128x128xbf16>
    %cst_29 = arith.constant dense<0.000000e+00> : vector<8x128xf32>
    %74 = tpu.matmul %72, %73, %cst_29 {dimension_numbers = #tpu.dot_dimension_numbers<[1], [0], [0], [1], [0, 0, 1, 1], [], []>} : vector<8x128xbf16>, vector<128x128xbf16>, vector<8x128xf32> -> vector<8x128xf32>
    %75 = arith.addf %74, %42 : vector<8x128xf32>
    %c4 = arith.constant 4 : index
    %c0_30 = arith.constant 0 : index
    %76 = vector.load %arg2[%c4, %c0_30] : memref<6x128xf32, #tpu.memory_space<vmem>>, vector<1x128xf32>
    %c5 = arith.constant 5 : index
    %c0_31 = arith.constant 0 : index
    %77 = vector.load %arg2[%c5, %c0_31] : memref<6x128xf32, #tpu.memory_space<vmem>>, vector<1x128xf32>
    %cst_32 = arith.constant dense<0.000000e+00> : vector<128xf32>
    %78 = vector.multi_reduction <add>, %75, %cst_32 [0] : vector<8x128xf32> to vector<128xf32>
    %79 = vector.shape_cast %78 : vector<128xf32> to vector<1x128xf32>
    %cst_33 = arith.constant 1.250000e-01 : f32
    %80 = vector.broadcast %cst_33 : f32 to vector<1x128xf32>
    %81 = arith.mulf %79, %80 : vector<1x128xf32>
    %82 = vector.broadcast %81 : vector<1x128xf32> to vector<8x128xf32>
    %83 = arith.subf %75, %82 : vector<8x128xf32>
    %84 = arith.mulf %83, %83 : vector<8x128xf32>
    %cst_34 = arith.constant dense<0.000000e+00> : vector<128xf32>
    %85 = vector.multi_reduction <add>, %84, %cst_34 [0] : vector<8x128xf32> to vector<128xf32>
    %86 = vector.shape_cast %85 : vector<128xf32> to vector<1x128xf32>
    %cst_35 = arith.constant 1.250000e-01 : f32
    %87 = vector.broadcast %cst_35 : f32 to vector<1x128xf32>
    %88 = arith.mulf %86, %87 : vector<1x128xf32>
    %cst_36 = arith.constant 9.99999974E-6 : f32
    %89 = vector.broadcast %cst_36 : f32 to vector<1x128xf32>
    %90 = arith.addf %88, %89 : vector<1x128xf32>
    %91 = math.rsqrt %90 : vector<1x128xf32>
    %92 = arith.mulf %76, %91 : vector<1x128xf32>
    %93 = vector.broadcast %92 : vector<1x128xf32> to vector<8x128xf32>
    %94 = arith.mulf %83, %93 : vector<8x128xf32>
    %95 = vector.broadcast %77 : vector<1x128xf32> to vector<8x128xf32>
    %96 = arith.addf %94, %95 : vector<8x128xf32>
    %cst_37 = arith.constant 0.000000e+00 : f32
    %97 = vector.broadcast %cst_37 : f32 to vector<8x128xf32>
    %98 = arith.cmpf ogt, %96, %97 : vector<8x128xf32>
    %99 = math.exp %96 : vector<8x128xf32>
    %cst_38 = arith.constant 1.000000e+00 : f32
    %100 = vector.broadcast %cst_38 : f32 to vector<8x128xf32>
    %101 = arith.subf %99, %100 : vector<8x128xf32>
    %102 = arith.select %98, %96, %101 : vector<8x128xi1>, vector<8x128xf32>
    %c2_i32_39 = arith.constant 2 : i32
    %103 = tpu.memref_slice %arg11[%c2_i32_39] : memref<3x!tpu.dma_semaphore, #tpu.memory_space<semaphore_mem>> -> memref<1x!tpu.dma_semaphore, #tpu.memory_space<semaphore_mem>>
    %104 = tpu.memref_squeeze %103 : memref<1x!tpu.dma_semaphore, #tpu.memory_space<semaphore_mem>> -> memref<!tpu.dma_semaphore, #tpu.memory_space<semaphore_mem>>
    tpu.wait_dma2 semaphore(%104 : memref<!tpu.dma_semaphore, #tpu.memory_space<semaphore_mem>>) src(%arg6 : memref<128x128xbf16, #tpu.memory_space<any>>) dst(%arg10 : memref<128x128xbf16, #tpu.memory_space<vmem>>)
    %105 = arith.truncf %102 : vector<8x128xf32> to vector<8x128xbf16>
    %c0_40 = arith.constant 0 : index
    %c0_41 = arith.constant 0 : index
    %106 = vector.load %arg10[%c0_40, %c0_41] : memref<128x128xbf16, #tpu.memory_space<vmem>>, vector<128x128xbf16>
    %cst_42 = arith.constant dense<0.000000e+00> : vector<8x128xf32>
    %107 = tpu.matmul %105, %106, %cst_42 {dimension_numbers = #tpu.dot_dimension_numbers<[1], [0], [0], [1], [0, 0, 1, 1], [], []>} : vector<8x128xbf16>, vector<128x128xbf16>, vector<8x128xf32> -> vector<8x128xf32>
    %c0_43 = arith.constant 0 : index
    %c0_44 = arith.constant 0 : index
    %108 = vector.load %arg3[%c0_43, %c0_44] : memref<1x128xf32, #tpu.memory_space<vmem>>, vector<1x128xf32>
    %109 = vector.broadcast %108 : vector<1x128xf32> to vector<8x128xf32>
    %110 = arith.addf %107, %109 : vector<8x128xf32>
    %111 = arith.addf %110, %6 : vector<8x128xf32>
    %c0_45 = arith.constant 0 : index
    %c0_46 = arith.constant 0 : index
    %112 = vector.load %arg7[%c0_45, %c0_46] : memref<8x128xf32, #tpu.memory_space<vmem>>, vector<8x128xf32>
    tpu.vector_store %arg7[%c0_45, %c0_46], %111 {strides = array<i32>} : memref<8x128xf32, #tpu.memory_space<vmem>>, vector<8x128xf32>,
    return
  }
}

</mosaic_0001>

<bundles_post_ra>
// kernel: tpu_custom_call.1
= control target key start
LH: loop header
LB: loop body
LE: loop exit
PB: predicated region body
PF: predicated region fallthrough
CT: control target
= control target key end

     0   :  { %12 = vsyncpa [#allocation7], 0  ;;  %s1048_s0 = inlined_call_operand.hbm [shape: f32[8,128], index: 0, kind: input, shape index: {}]   ;;  %s1049_s1 = inlined_call_operand.hbm [shape: bf16[128,128], index: 1, kind: input, shape index: {}]   ;;  %s1050_s2 = inlined_call_operand.hbm [shape: f32[6,128], index: 2, kind: input, shape index: {}]   ;;  %s1051_s3 = inlined_call_operand.vmem [shape: f32[1,128], index: 3, kind: input, shape index: {}]   ;;  %s1052_s4 = inlined_call_operand.hbm [shape: bf16[128,128], index: 4, kind: input, shape index: {}]   ;;  %s1053_s5 = inlined_call_operand.hbm [shape: bf16[128,128], index: 5, kind: input, shape index: {}]   ;;  %s1054_s6 = inlined_call_operand.hbm [shape: bf16[128,128], index: 6, kind: input, shape index: {}]   ;;  %s1055_s7 = inlined_call_operand.hbm [shape: f32[8,128], index: 7, kind: output, shape index: {}]  }
   0x1   :  { %13 = vsyncpa [#allocation10], 0  ;;  %s30_s26 = sshll.u32 %s1049_s1, 4  ;;  %s31_s26 = int_to_ptr.hbm [resolvable:$true] %s30_s26 }
   0x2   :  { %14 = vsyncpa [#allocation8], 0  ;;  %s958_s27 = smov [#allocation9]   ;;  %s20_s8 = sshll.u32 %s1048_s0, 4  ;;  %s21_s8 = int_to_ptr.hbm [resolvable:$true] %s20_s8 }
   0x3   :  { %s32_s28 = sshll.u32 %s958_s27, 4  ;;  %s959_s9 = smov 64   ;;  %s33_s28 = int_to_ptr.vmem [resolvable:$true] %s32_s28 }
   0x4   :  { %s960_s10 = smov 4   ;;  %s961_s11 = smov [#allocation6]  }
   0x5   :  { %38 = dma.hbm_to_vmem [thread:$0]  %s31_s26, 1024, %s33_s28, [#allocation10], %s959_s9, %s959_s9, %s960_s10  }
   0x6   :  { %s22_s12 = sshll.u32 %s961_s11, 4  ;;  %s44_s15 = sshll.u32 %s1050_s2, 4  ;;  %s23_s12 = int_to_ptr.vmem [resolvable:$true] %s22_s12  ;;  %s45_s15 = int_to_ptr.hbm [resolvable:$true] %s44_s15 }
   0x7   :  { %25 = dma.hbm_to_vmem [thread:$0]  %s21_s8, 128, %s23_s12, [#allocation7]  }
   0x8   :  { %s962_s1 = smov [#allocation11]  }
   0x9   :  { %s46_s16 = sshll.u32 %s962_s1, 4  ;;  %s47_s16 = int_to_ptr.vmem [resolvable:$true] %s46_s16 }
   0xa   :  { %49 = dma.hbm_to_vmem [thread:$0]  %s45_s15, 128, %s47_s16, [#allocation10]  }
   0xb   :  { %946 = dma.done.wait [#allocation7], 128  }
   0xc   :  { %947 = vsyncadd [#allocation7], 4294967168 }
   0xd   :  { %948 = dma.done.wait [#allocation10], 1152  }
   0xe   :  { %949 = vsyncadd [#allocation10], 4294966144  ;;  %v728_v0 = vld [vmem:[#allocation9 + $0x38] sm:$0xff]  ;;  %v727_v1 = vld [vmem:[#allocation9 + $0x30] sm:$0xff]  ;;  %s71_s17 = sshll.u32 %s1052_s4, 4  ;;  %s963_s18 = smov [#allocation2]   ;;  %s72_s17 = int_to_ptr.hbm [resolvable:$true] %s71_s17 }
   0xf   :  { %171 = vmatpush.bf16.msra.mxu0 %v728_v0  ;;  %v726_v2 = vld [vmem:[#allocation9 + $0x28] sm:$0xff]  ;;  %v725_v3 = vld [vmem:[#allocation9 + $0x20] sm:$0xff]  ;;  %v724_v4 = vld [vmem:[#allocation9 + $0x18] sm:$0xff]  ;;  %s73_s19 = sshll.u32 %s963_s18, 4  ;;  %s85_s22 = sshll.u32 %s1053_s5, 4  ;;  %s74_s19 = int_to_ptr.vmem [resolvable:$true] %s73_s19  ;;  %s86_s22 = int_to_ptr.hbm [resolvable:$true] %s85_s22 }
  0x10   :  { %v723_v5 = vld [vmem:[#allocation9 + $0x10] sm:$0xff]  ;;  %v722_v6 = vld [vmem:[#allocation9 + $0x8] sm:$0xff]  ;;  %v721_v7 = vld [vmem:[#allocation9] sm:$0xff]  ;;  %76 = dma.hbm_to_vmem [thread:$0]  %s72_s17, 1024, %s74_s19, [#allocation5] }
  0x11   :  { %v1016_v8 = vld [vmem:[#allocation6] sm:$0xff]  ;;  %s964_s23 = smov [#allocation3]   ;;  %s99_s27 = sshll.u32 %s1054_s6, 4  ;;  %v184_v34 = vld [vmem:[#allocation11] sm:$0x1]  ;;  %s100_s27 = int_to_ptr.hbm [resolvable:$true] %s99_s27 }
  0x12   :  { %v106_v9 = vpack.c.bf16 %v1016_v8, %v1016_v8  ;;  %s87_s24 = sshll.u32 %s964_s23, 4  ;;  %s965_s4 = smov [#allocation4]   ;;  %v762_v39 = vld [vmem:[#allocation11 + $0x1] ss:$0 sm:$0xff]  ;;  %s88_s24 = int_to_ptr.vmem [resolvable:$true] %s87_s24 }
  0x13   :  { %172 = vmatpush.bf16.msra.mxu0 %v727_v1  ;;  %90 = dma.hbm_to_vmem [thread:$0]  %s86_s22, 1024, %s88_s24, [#allocation5 + $0x1] }
  0x14   :  { %s101_s28 = sshll.u32 %s965_s4, 4  ;;  %s102_s28 = int_to_ptr.vmem [resolvable:$true] %s101_s28 }
  0x15   :  { %104 = dma.hbm_to_vmem [thread:$0]  %s100_s27, 1024, %s102_s28, [#allocation5 + $0x2] }
  0x17   :  { %173 = vmatpush.bf16.msra.mxu0 %v726_v2 }
  0x1b   :  { %174 = vmatpush.bf16.msra.mxu0 %v725_v3 }
  0x1f   :  { %175 = vmatpush.bf16.msra.mxu0 %v724_v4 }
  0x23   :  { %176 = vmatpush.bf16.msra.mxu0 %v723_v5 }
  0x27   :  { %177 = vmatpush.bf16.msra.mxu0 %v722_v6 }
  0x2b   :  { %178 = vmatpush.bf16.msra.mxu0 %v721_v7 }
  0x2e   :  { %179 = vmatmul.bf16.vlgmr.msra.gmra.mxu0 %v106_v9 }
  0xab   :  { %v1029_v10 = vpop.f32.mrf.mxu0 }
  0xac   :  { %v186_v11 = vrot.slane %v1029_v10, 4 }
  0xae   :  { %v187_v12 = vadd.f32 %v186_v11, %v1029_v10 }
  0xb0   :  { %v188_v13 = vrot.slane %v187_v12, 2 }
  0xb2   :  { %v189_v14 = vadd.f32 %v188_v13, %v187_v12 }
  0xb3   :  { %v182_v15 = vpop.f32.mrf.mxu0 }
  0xb4   :  { %v190_v16 = vrot.slane %v189_v14, 1 }
  0xb6   :  { %v191_v17 = vadd.f32 %v190_v16, %v189_v14 }
  0xb8   :  { %v192_v18 = vmul.f32 0.125, %v191_v17 }
  0xba   :  { %v193_v19 = vsub.f32 %v1029_v10, %v192_v18 }
  0xbc   :  { %v194_v20 = vmul.f32 %v193_v19, %v193_v19 }
  0xbe   :  { %v195_v21 = vrot.slane %v194_v20, 4 }
  0xc0   :  { %v196_v22 = vadd.f32 %v195_v21, %v194_v20 }
  0xc2   :  { %v197_v23 = vrot.slane %v196_v22, 2 }
  0xc4   :  { %v198_v24 = vadd.f32 %v197_v23, %v196_v22 }
  0xc6   :  { %v199_v25 = vrot.slane %v198_v24, 1 }
  0xc8   :  { %v200_v26 = vadd.f32 %v199_v25, %v198_v24 }
  0xca   :  { %v201_v27 = vmul.f32 0.125, %v200_v26 }
  0xcc   :  { %v202_v28 = vadd.f32 1e-05, %v201_v27 }
  0xce   :  { %763 = vrsqrt.f32 %v202_v28  ;;  %vm209_vm1 = vweird.f32 %v202_v28 }
  0xd4   :  { %v764_v29 = vpop.eup %763 }
  0xd5   :  { %v204_v30 = vmul.f32 %v764_v29, %v202_v28  ;;  %vm210_vm0 = vweird.f32 %v764_v29 }
  0xd6   :  { %vm211_vm2 = vmor %vm209_vm1, %vm210_vm0 }
  0xd7   :  { %v205_v31 = vmul.f32 %v764_v29, %v204_v30 }
  0xd9   :  { %v206_v32 = vmul.f32 0.5, %v205_v31 }
  0xdb   :  { %v207_v33 = vsub.f32 1.5, %v206_v32 }
  0xdd   :  { %v208_v35 = vmul.f32 %v764_v29, %v207_v33 }
  0xdf   :  { %v212_v36 = vsel %vm211_vm2, %v764_v29, %v208_v35 }
  0xe0   :  { %v213_v37 = vmul.f32 %v212_v36, %v184_v34 }
  0xe2   :  { %v214_v38 = vperm.slane %v213_v37, 0 }
  0xe4   :  { %v215_v40 = vmul.f32 %v214_v38, %v193_v19 }
  0xe6   :  { %v217_v41 = vadd.f32 %v762_v39, %v215_v40 }
  0xe8   :  { %v219_v42 = vmul.f32 1.442695, %v217_v41  ;;  %vm218_vm3 = vcmp.gt.f32.partialorder %v217_v41, 0.0 }
  0xea   :  { %765 = vpow2.f32 %v219_v42 }
  0xf0   :  { %v766_v43 = vpop.eup %765 }
  0xf1   :  { %v619_v44 = vadd.f32 -1.0, %v766_v43 }
  0xf3   :  { %v222_v45 = vsel %vm218_vm3, %v217_v41, %v619_v44 }
  0xf4   :  { %950 = dma.done.wait [#allocation5], 1024 }
  0xf5   :  { %951 = vsyncadd [#allocation5], 4294966272  ;;  %v736_v46 = vld [vmem:[#allocation2 + $0x38] sm:$0xff]  ;;  %v735_v47 = vld [vmem:[#allocation2 + $0x30] sm:$0xff]  ;;  %v227_v54 = vpack.c.bf16 %v222_v45, %v222_v45 }
  0xf6   :  { %292 = vmatpush.bf16.msra.mxu1 %v736_v46  ;;  %v734_v48 = vld [vmem:[#allocation2 + $0x28] sm:$0xff]  ;;  %v733_v49 = vld [vmem:[#allocation2 + $0x20] sm:$0xff]  ;;  %v732_v50 = vld [vmem:[#allocation2 + $0x18] sm:$0xff] }
  0xf7   :  { %v731_v51 = vld [vmem:[#allocation2 + $0x10] sm:$0xff]  ;;  %v730_v52 = vld [vmem:[#allocation2 + $0x8] sm:$0xff]  ;;  %v729_v53 = vld [vmem:[#allocation2] sm:$0xff] }
  0xf8   :  { %v305_v17 = vld [vmem:[#allocation11 + $0x2] sm:$0x1]  ;;  %v767_v22 = vld [vmem:[#allocation11 + $0x3] ss:$0 sm:$0xff] }
  0xfa   :  { %293 = vmatpush.bf16.msra.mxu1 %v735_v47 }
  0xfe   :  { %294 = vmatpush.bf16.msra.mxu1 %v734_v48 }
 0x102   :  { %295 = vmatpush.bf16.msra.mxu1 %v733_v49 }
 0x106   :  { %296 = vmatpush.bf16.msra.mxu1 %v732_v50 }
 0x10a   :  { %297 = vmatpush.bf16.msra.mxu1 %v731_v51 }
 0x10e   :  { %298 = vmatpush.bf16.msra.mxu1 %v730_v52 }
 0x112   :  { %299 = vmatpush.bf16.msra.mxu1 %v729_v53 }
 0x115   :  { %300 = vmatmul.bf16.vlgmr.msra.gmra.mxu1 %v227_v54 }
 0x192   :  { %v301_v55 = vpop.f32.mrf.mxu1 }
 0x193   :  { %v1035_v56 = vadd.f32 %v301_v55, %v1029_v10 }
 0x195   :  { %v307_v57 = vrot.slane %v1035_v56, 4 }
 0x197   :  { %v308_v58 = vadd.f32 %v307_v57, %v1035_v56 }
 0x199   :  { %v309_v59 = vrot.slane %v308_v58, 2 }
 0x19a   :  { %v303_v60 = vpop.f32.mrf.mxu1 }
 0x19b   :  { %v310_v61 = vadd.f32 %v309_v59, %v308_v58 }
 0x19d   :  { %v311_v62 = vrot.slane %v310_v61, 1 }
 0x19f   :  { %v312_v63 = vadd.f32 %v311_v62, %v310_v61 }
 0x1a1   :  { %v313_v0 = vmul.f32 0.125, %v312_v63 }
 0x1a3   :  { %v314_v1 = vsub.f32 %v1035_v56, %v313_v0 }
 0x1a5   :  { %v315_v2 = vmul.f32 %v314_v1, %v314_v1 }
 0x1a7   :  { %v316_v3 = vrot.slane %v315_v2, 4 }
 0x1a9   :  { %v317_v4 = vadd.f32 %v316_v3, %v315_v2 }
 0x1ab   :  { %v318_v5 = vrot.slane %v317_v4, 2 }
 0x1ad   :  { %v319_v6 = vadd.f32 %v318_v5, %v317_v4 }
 0x1af   :  { %v320_v7 = vrot.slane %v319_v6, 1 }
 0x1b1   :  { %v321_v9 = vadd.f32 %v320_v7, %v319_v6 }
 0x1b3   :  { %v322_v10 = vmul.f32 0.125, %v321_v9 }
 0x1b5   :  { %v323_v11 = vadd.f32 1e-05, %v322_v10 }
 0x1b7   :  { %768 = vrsqrt.f32 %v323_v11  ;;  %vm330_vm5 = vweird.f32 %v323_v11 }
 0x1bd   :  { %v769_v12 = vpop.eup %768 }
 0x1be   :  { %v325_v13 = vmul.f32 %v769_v12, %v323_v11  ;;  %vm331_vm4 = vweird.f32 %v769_v12 }
 0x1bf   :  { %vm332_vm6 = vmor %vm330_vm5, %vm331_vm4 }
 0x1c0   :  { %v326_v14 = vmul.f32 %v769_v12, %v325_v13 }
 0x1c2   :  { %v327_v15 = vmul.f32 0.5, %v326_v14 }
 0x1c4   :  { %v328_v16 = vsub.f32 1.5, %v327_v15 }
 0x1c6   :  { %v329_v18 = vmul.f32 %v769_v12, %v328_v16 }
 0x1c8   :  { %v333_v19 = vsel %vm332_vm6, %v769_v12, %v329_v18 }
 0x1c9   :  { %v334_v20 = vmul.f32 %v333_v19, %v305_v17 }
 0x1cb   :  { %v335_v21 = vperm.slane %v334_v20, 0 }
 0x1cd   :  { %v336_v23 = vmul.f32 %v335_v21, %v314_v1 }
 0x1cf   :  { %v338_v24 = vadd.f32 %v767_v22, %v336_v23 }
 0x1d1   :  { %v340_v25 = vmul.f32 1.442695, %v338_v24  ;;  %vm339_vm7 = vcmp.gt.f32.partialorder %v338_v24, 0.0 }
 0x1d3   :  { %770 = vpow2.f32 %v340_v25 }
 0x1d9   :  { %v771_v26 = vpop.eup %770 }
 0x1da   :  { %v652_v27 = vadd.f32 -1.0, %v771_v26 }
 0x1dc   :  { %v343_v28 = vsel %vm339_vm7, %v338_v24, %v652_v27 }
 0x1dd   :  { %952 = dma.done.wait [#allocation5 + $0x1], 1024 }
 0x1de   :  { %953 = vsyncadd [#allocation5 + $0x1], 4294966272  ;;  %v744_v29 = vld [vmem:[#allocation3 + $0x38] sm:$0xff]  ;;  %v743_v30 = vld [vmem:[#allocation3 + $0x30] sm:$0xff]  ;;  %v346_v37 = vpack.c.bf16 %v343_v28, %v343_v28 }
 0x1df   :  { %411 = vmatpush.bf16.msra.mxu2 %v744_v29  ;;  %v742_v31 = vld [vmem:[#allocation3 + $0x28] sm:$0xff]  ;;  %v741_v32 = vld [vmem:[#allocation3 + $0x20] sm:$0xff]  ;;  %v740_v33 = vld [vmem:[#allocation3 + $0x18] sm:$0xff] }
 0x1e0   :  { %v739_v34 = vld [vmem:[#allocation3 + $0x10] sm:$0xff]  ;;  %v738_v35 = vld [vmem:[#allocation3 + $0x8] sm:$0xff]  ;;  %v737_v36 = vld [vmem:[#allocation3] sm:$0xff] }
 0x1e1   :  { %v424_v63 = vld [vmem:[#allocation11 + $0x4] sm:$0x1]  ;;  %v772_v4 = vld [vmem:[#allocation11 + $0x5] ss:$0 sm:$0xff] }
 0x1e3   :  { %412 = vmatpush.bf16.msra.mxu2 %v743_v30 }
 0x1e7   :  { %413 = vmatpush.bf16.msra.mxu2 %v742_v31 }
 0x1eb   :  { %414 = vmatpush.bf16.msra.mxu2 %v741_v32 }
 0x1ef   :  { %415 = vmatpush.bf16.msra.mxu2 %v740_v33 }
 0x1f3   :  { %416 = vmatpush.bf16.msra.mxu2 %v739_v34 }
 0x1f7   :  { %417 = vmatpush.bf16.msra.mxu2 %v738_v35 }
 0x1fb   :  { %418 = vmatpush.bf16.msra.mxu2 %v737_v36 }
 0x1fe   :  { %419 = vmatmul.bf16.vlgmr.msra.gmra.mxu2 %v346_v37 }
 0x281   :  { %v420_v38 = vpop.f32.mrf.mxu2 }
 0x282   :  { %v421_v39 = vadd.f32 %v420_v38, %v1035_v56 }
 0x284   :  { %v426_v40 = vrot.slane %v421_v39, 4 }
 0x286   :  { %v427_v41 = vadd.f32 %v426_v40, %v421_v39 }
 0x288   :  { %v428_v42 = vrot.slane %v427_v41, 2 }
 0x289   :  { %v422_v43 = vpop.f32.mrf.mxu2 }
 0x28a   :  { %v429_v44 = vadd.f32 %v428_v42, %v427_v41 }
 0x28c   :  { %v430_v45 = vrot.slane %v429_v44, 1 }
 0x28e   :  { %v431_v46 = vadd.f32 %v430_v45, %v429_v44 }
 0x290   :  { %v432_v47 = vmul.f32 0.125, %v431_v46 }
 0x292   :  { %v433_v48 = vsub.f32 %v421_v39, %v432_v47 }
 0x294   :  { %v434_v49 = vmul.f32 %v433_v48, %v433_v48 }
 0x296   :  { %v435_v50 = vrot.slane %v434_v49, 4 }
 0x298   :  { %v436_v51 = vadd.f32 %v435_v50, %v434_v49 }
 0x29a   :  { %v437_v52 = vrot.slane %v436_v51, 2 }
 0x29c   :  { %v438_v53 = vadd.f32 %v437_v52, %v436_v51 }
 0x29e   :  { %v439_v54 = vrot.slane %v438_v53, 1 }
 0x2a0   :  { %v440_v55 = vadd.f32 %v439_v54, %v438_v53 }
 0x2a2   :  { %v441_v57 = vmul.f32 0.125, %v440_v55 }
 0x2a4   :  { %v442_v58 = vadd.f32 1e-05, %v441_v57 }
 0x2a6   :  { %773 = vrsqrt.f32 %v442_v58  ;;  %vm449_vm9 = vweird.f32 %v442_v58 }
 0x2ac   :  { %v774_v56 = vpop.eup %773 }
 0x2ad   :  { %v444_v59 = vmul.f32 %v774_v56, %v442_v58  ;;  %vm450_vm8 = vweird.f32 %v774_v56 }
 0x2ae   :  { %vm451_vm10 = vmor %vm449_vm9, %vm450_vm8 }
 0x2af   :  { %v445_v60 = vmul.f32 %v774_v56, %v444_v59 }
 0x2b1   :  { %v446_v61 = vmul.f32 0.5, %v445_v60 }
 0x2b3   :  { %v447_v62 = vsub.f32 1.5, %v446_v61 }
 0x2b5   :  { %v448_v0 = vmul.f32 %v774_v56, %v447_v62 }
 0x2b7   :  { %v452_v1 = vsel %vm451_vm10, %v774_v56, %v448_v0 }
 0x2b8   :  { %v453_v2 = vmul.f32 %v452_v1, %v424_v63 }
 0x2ba   :  { %v454_v3 = vperm.slane %v453_v2, 0 }
 0x2bc   :  { %v455_v5 = vmul.f32 %v454_v3, %v433_v48 }
 0x2be   :  { %v457_v6 = vadd.f32 %v772_v4, %v455_v5 }
 0x2c0   :  { %v459_v7 = vmul.f32 1.442695, %v457_v6  ;;  %vm458_vm11 = vcmp.gt.f32.partialorder %v457_v6, 0.0 }
 0x2c2   :  { %775 = vpow2.f32 %v459_v7 }
 0x2c8   :  { %v776_v9 = vpop.eup %775 }
 0x2c9   :  { %v685_v10 = vadd.f32 -1.0, %v776_v9 }
 0x2cb   :  { %v462_v11 = vsel %vm458_vm11, %v457_v6, %v685_v10 }
 0x2cc   :  { %954 = dma.done.wait [#allocation5 + $0x2], 1024 }
 0x2cd   :  { %955 = vsyncadd [#allocation5 + $0x2], 4294966272  ;;  %v752_v12 = vld [vmem:[#allocation4 + $0x38] sm:$0xff]  ;;  %v751_v13 = vld [vmem:[#allocation4 + $0x30] sm:$0xff]  ;;  %v465_v20 = vpack.c.bf16 %v462_v11, %v462_v11  ;;  %s966_s29 = smov [#allocation12]   ;;  %s556_s10 = sshll.u32 %s1055_s7, 4  ;;  %s557_s10 = int_to_ptr.hbm [resolvable:$true] %s556_s10 }
 0x2ce   :  { %534 = vmatpush.bf16.msra.mxu3 %v752_v12  ;;  %v750_v14 = vld [vmem:[#allocation4 + $0x28] sm:$0xff]  ;;  %v749_v15 = vld [vmem:[#allocation4 + $0x20] sm:$0xff]  ;;  %v748_v16 = vld [vmem:[#allocation4 + $0x18] sm:$0xff]  ;;  %s554_s30 = sshll.u32 %s966_s29, 4  ;;  %s555_s30 = int_to_ptr.vmem [resolvable:$true] %s554_s30 }
 0x2cf   :  { %v747_v17 = vld [vmem:[#allocation4 + $0x10] sm:$0xff]  ;;  %v746_v18 = vld [vmem:[#allocation4 + $0x8] sm:$0xff]  ;;  %v745_v19 = vld [vmem:[#allocation4] sm:$0xff] }
 0x2d0   :  { %v777_v21 = vld [vmem:[%s1051_s3] ss:$0 sm:$0xff] }
 0x2d2   :  { %535 = vmatpush.bf16.msra.mxu3 %v751_v13 }
 0x2d6   :  { %536 = vmatpush.bf16.msra.mxu3 %v750_v14 }
 0x2da   :  { %537 = vmatpush.bf16.msra.mxu3 %v749_v15 }
 0x2de   :  { %538 = vmatpush.bf16.msra.mxu3 %v748_v16 }
 0x2e2   :  { %539 = vmatpush.bf16.msra.mxu3 %v747_v17 }
 0x2e6   :  { %540 = vmatpush.bf16.msra.mxu3 %v746_v18 }
 0x2ea   :  { %541 = vmatpush.bf16.msra.mxu3 %v745_v19 }
 0x2ed   :  { %542 = vmatmul.bf16.vlgmr.msra.gmra.mxu3 %v465_v20 }
 0x370   :  { %v543_v22 = vpop.f32.mrf.mxu3 }
 0x371   :  { %v544_v23 = vadd.f32 %v777_v21, %v543_v22 }
 0x373   :  { %v547_v24 = vadd.f32 %v544_v23, %v1016_v8 }
 0x375   :  { %548 = vst [vmem:[#allocation12] sm:$0xff] %v547_v24 }
 0x376   :  { %559 = dma.vmem_to_hbm [thread:$0]  %s555_s30, 128, %s557_s10, [#allocation8]  }
 0x378   :  { %v545_v25 = vpop.f32.mrf.mxu3 }
 0x379   :  { %956 = dma.done.wait [#allocation8], 128  }
 0x37a   :  { %957 = vsyncadd [#allocation8], 4294967168 }
 0x37b   :  { %564 = vsyncpa [#allocation7], 1 }
 0x37c   :  { %565 = vsyncpa [#allocation10], 1 }
 0x37d   :  { %566 = vsyncpa [#allocation8], 1 }
 0x37e   :  { %567 = vsyncmov [#allocation5] }
 0x381   :  { %s568_s3 = vpop.sfrf %567 }
 0x382   :  { %p718_p0 = scmp.ne.s32.totalorder %s568_s3, 0 }
 0x384   :  { %572 = shalt.err (%p718_p0)  }
 0x385   :  { %574 = vsyncmov [#allocation5 + $0x1] }
 0x388   :  { %s575_s11 = vpop.sfrf %574 }
 0x389   :  { %p719_p1 = scmp.ne.s32.totalorder %s575_s11, 0 }
 0x38b   :  { %579 = shalt.err (%p719_p1)  }
 0x38c   :  { %581 = vsyncmov [#allocation5 + $0x2] }
 0x38f   :  { %s582_s7 = vpop.sfrf %581 }
 0x390   :  { %p720_p2 = scmp.ne.s32.totalorder %s582_s7, 0 }
 0x392   :  { %586 = shalt.err (%p720_p2)  }

</bundles_post_ra>
